<compile_context>
chip_gen: v7x
topology: tpu7x:2x2x1
jax: 0.10.0
libtpu: 0.0.40
codegen_flags: <defaults>
</compile_context>

<pallas_src>
import functools

import jax
import jax.numpy as jnp
from jax.experimental import pallas as pl
from jax.experimental.pallas import tpu as pltpu

ALPHA1 = 50.0
ALPHA2 = 1.0

_LANE = 128
_BLOCK_ROWS_TARGET = 8192          # 8192 x 128 f32 = 4 MiB per input block
_NUM_SHARDS = 2                    # TensorCore split on v7x; loop elsewhere
_VMEM_LIMIT_BYTES = 32 * 1024 * 1024  # raise v5e's 16 MiB scoped default


def _sse_kernel(a_ref, b_ref, o_ref, *, rows, block_rows, blocks_per_shard,
                mask_needed):
    """Accumulate sum((a - b)^2) into the resident (1, 8, 128) output block."""
    c = pl.program_id(0)          # shard (TensorCore) index
    i = pl.program_id(1)          # block index within the shard

    @pl.when(i == 0)
    def _():
        o_ref[...] = jnp.zeros_like(o_ref)

    d = a_ref[...].astype(jnp.float32) - b_ref[...].astype(jnp.float32)

    def _fast_accum():
        # Pure-VPU partial reduction: collapse sublane groups onto the
        # vreg-shaped (8, 128) output accumulator; the cross-lane/sublane
        # reduce happens on the tiny partial-sum output in the wrapper.
        o_ref[0] += jnp.sum((d * d).reshape(-1, 8, _LANE), axis=0)

    if not mask_needed:
        # Statically known: every block is full and in range -> no mask ops.
        _fast_accum()
    else:
        block_idx = c * blocks_per_shard + i
        is_ragged = (block_idx + 1) * block_rows > rows

        @pl.when(jnp.logical_not(is_ragged))
        def _():
            _fast_accum()

        @pl.when(is_ragged)
        def _():
            # Mask rows past the true row count (ragged last block and fully
            # out-of-range shard blocks whose index_map was clamped).  Mask
            # before squaring so stale/NaN pad data cannot leak.
            row = jax.lax.broadcasted_iota(jnp.int32, (block_rows, _LANE), 0)
            global_row = block_idx * block_rows + row
            dm = jnp.where(global_row < rows, d, 0.0)
            o_ref[0] += jnp.sum((dm * dm).reshape(-1, 8, _LANE), axis=0)


def _leading_axis_semantics(num_shards):
    """Pick semantics for the shard axis; CORE_PARALLEL only on 2-TC v7x."""
    if num_shards != _NUM_SHARDS:
        return pltpu.ARBITRARY
    try:
        kind = jax.devices()[0].device_kind.lower()
    except Exception:  # pragma: no cover - defensive
        kind = ""
    if "v7" in kind or "tpu7" in kind:
        return pltpu.CORE_PARALLEL
    return pltpu.PARALLEL


def _sum_squared_error(a, b):
    """Pallas tiled reduction: sum((a - b)^2) over all elements."""
    assert a.shape == b.shape
    n = a.size

    a_flat = a.reshape(-1)
    b_flat = b.reshape(-1)

    # Lane-aligned prefix goes through the kernel; the <128-element tail (if
    # any) is summed directly in the wrapper instead of padding+copying the
    # whole flattened tensor.
    n_main = (n // _LANE) * _LANE
    tail_sse = None
    if n_main < n:
        ta = a_flat[n_main:].astype(jnp.float32)
        tb = b_flat[n_main:].astype(jnp.float32)
        tail_sse = jnp.sum((ta - tb) ** 2)

    if n_main == 0:
        return tail_sse

    rows = n_main // _LANE
    a2 = a_flat[:n_main].reshape(rows, _LANE)
    b2 = b_flat[:n_main].reshape(rows, _LANE)

    block_rows = min(_BLOCK_ROWS_TARGET, -(-rows // 8) * 8)
    blocks_total = pl.cdiv(rows, block_rows)
    num_shards = min(_NUM_SHARDS, blocks_total)
    blocks_per_shard = pl.cdiv(blocks_total, num_shards)

    # Statically decide whether any block can contain invalid rows (ragged
    # last block or shard-padding blocks re-reading a clamped block index).
    mask_needed = (rows % block_rows != 0) or (
        num_shards * blocks_per_shard != blocks_total)

    def in_map(c, i):
        # Clamp so shard-padding blocks re-read a valid block; those
        # iterations are fully masked inside the kernel.
        return (jnp.minimum(c * blocks_per_shard + i, blocks_total - 1), 0)

    kernel = functools.partial(
        _sse_kernel, rows=rows, block_rows=block_rows,
        blocks_per_shard=blocks_per_shard, mask_needed=mask_needed)

    partials = pl.pallas_call(
        kernel,
        out_shape=jax.ShapeDtypeStruct((num_shards, 8, _LANE), jnp.float32),
        grid_spec=pltpu.PrefetchScalarGridSpec(
            num_scalar_prefetch=0,
            grid=(num_shards, blocks_per_shard),
            in_specs=[
                pl.BlockSpec((block_rows, _LANE), in_map),
                pl.BlockSpec((block_rows, _LANE), in_map),
            ],
            out_specs=pl.BlockSpec((1, 8, _LANE), lambda c, i: (c, 0, 0)),
        ),
        compiler_params=pltpu.CompilerParams(
            dimension_semantics=(_leading_axis_semantics(num_shards),
                                 pltpu.ARBITRARY),
            vmem_limit_bytes=_VMEM_LIMIT_BYTES),
    )(a2, b2)

    sse = jnp.sum(partials)
    if tail_sse is not None:
        sse = sse + tail_sse
    return sse


def stab_loss(f1, i1, igt, alpha1=ALPHA1, alpha2=ALPHA2):
    """Pallas implementation of StabLoss.forward."""
    # STN is an identity stub in the reference module -> new_i = i1.
    del f1
    new_i = i1
    pixel = _sum_squared_error(new_i, igt) / jnp.float32(new_i.size)
    # TODO(synk): FeatureLoss is an unimplemented stub in the reference
    # (returns None, which would make `alpha2 * feature` fail in PyTorch);
    # treated as 0.0 here.
    feature = jnp.float32(0.0)
    return alpha1 * pixel + alpha2 * feature


if __name__ == "__main__":
    key = jax.random.PRNGKey(0)
    k_f1, k_i1, k_igt = jax.random.split(key, 3)

    # Small NCHW shapes: f1 is a feature map, i1/igt are images.
    f1 = jax.random.normal(k_f1, (2, 4, 16, 16), dtype=jnp.float32)
    i1 = jax.random.normal(k_i1, (2, 3, 16, 16), dtype=jnp.float32)
    igt = jax.random.normal(k_igt, (2, 3, 16, 16), dtype=jnp.float32)

    loss = jax.jit(stab_loss)(f1, i1, igt)
    loss = jax.block_until_ready(loss)
    ref = ALPHA1 * jnp.mean((i1 - igt) ** 2) + ALPHA2 * 0.0
    assert jnp.allclose(loss, ref, rtol=1e-5, atol=1e-5), (loss, ref)

    # Second check: non-lane-aligned size exercises the prefix + tail paths.
    k_a, k_b = jax.random.split(k_f1)
    i1b = jax.random.normal(k_a, (1, 3, 20, 20), dtype=jnp.float32)
    igtb = jax.random.normal(k_b, (1, 3, 20, 20), dtype=jnp.float32)
    loss_b = jax.block_until_ready(jax.jit(stab_loss)(f1, i1b, igtb))
    ref_b = ALPHA1 * jnp.mean((i1b - igtb) ** 2)
    assert jnp.allclose(loss_b, ref_b, rtol=1e-5, atol=1e-5), (loss_b, ref_b)

    print("KERNEL_OK")
</pallas_src>

<mosaic_0001>
module attributes {stable_mosaic.version = 11 : i64} {
  func.func @_sse_kernel(%arg0: i32, %arg1: i32, %arg2: memref<16x128xf32, #tpu.memory_space<vmem>>, %arg3: memref<16x128xf32, #tpu.memory_space<vmem>>, %arg4: memref<1x8x128xf32, #tpu.memory_space<vmem>>) attributes {dimension_semantics = [#tpu.dimension_semantics<arbitrary>, #tpu.dimension_semantics<arbitrary>], iteration_bounds = array<i64: 1, 1>, scalar_prefetch = 0 : i64, scratch_operands = 0 : i64, tpu.core_type = #tpu.core_type<tc>, window_params = [{transform_indices = @transform_0, window_bounds = array<i64: 16, 128>}, {transform_indices = @transform_1, window_bounds = array<i64: 16, 128>}, {transform_indices = @transform_2, window_bounds = array<i64: 1, 8, 128>}]} {
    %c0_i32 = arith.constant 0 : i32
    %0 = arith.cmpi eq, %arg1, %c0_i32 : i32
    %1 = arith.extui %0 : i1 to i32
    %c0_i32_0 = arith.constant 0 : i32
    %2 = arith.cmpi ne, %1, %c0_i32_0 : i32
    scf.if %2 {
      %cst = arith.constant 0.000000e+00 : f32
      %16 = vector.broadcast %cst : f32 to vector<1x8x128xf32>
      %c0_7 = arith.constant 0 : index
      %c0_8 = arith.constant 0 : index
      %c0_9 = arith.constant 0 : index
      %17 = vector.load %arg4[%c0_7, %c0_8, %c0_9] : memref<1x8x128xf32, #tpu.memory_space<vmem>>, vector<1x8x128xf32>
      tpu.vector_store %arg4[%c0_7, %c0_8, %c0_9], %16 {strides = array<i32>} : memref<1x8x128xf32, #tpu.memory_space<vmem>>, vector<1x8x128xf32>,
    } else {
    }
    %c0 = arith.constant 0 : index
    %c0_1 = arith.constant 0 : index
    %3 = vector.load %arg2[%c0, %c0_1] : memref<16x128xf32, #tpu.memory_space<vmem>>, vector<16x128xf32>
    %c0_2 = arith.constant 0 : index
    %c0_3 = arith.constant 0 : index
    %4 = vector.load %arg3[%c0_2, %c0_3] : memref<16x128xf32, #tpu.memory_space<vmem>>, vector<16x128xf32>
    %5 = arith.subf %3, %4 : vector<16x128xf32>
    %c1_i32 = arith.constant 1 : i32
    %6 = arith.muli %arg0, %c1_i32 : i32
    %7 = arith.addi %6, %arg1 : i32
    %c1_i32_4 = arith.constant 1 : i32
    %8 = arith.addi %7, %c1_i32_4 : i32
    %c16_i32 = arith.constant 16 : i32
    %9 = arith.muli %8, %c16_i32 : i32
    %c12_i32 = arith.constant 12 : i32
    %10 = arith.cmpi sgt, %9, %c12_i32 : i32
    %true = arith.constant true
    %11 = arith.xori %10, %true : i1
    %12 = arith.extui %11 : i1 to i32
    %c0_i32_5 = arith.constant 0 : i32
    %13 = arith.cmpi ne, %12, %c0_i32_5 : i32
    scf.if %13 {
      %c0_7 = arith.constant 0 : index
      %c0_8 = arith.constant 0 : index
      %c0_9 = arith.constant 0 : index
      %16 = vector.load %arg4[%c0_7, %c0_8, %c0_9] : memref<1x8x128xf32, #tpu.memory_space<vmem>>, vector<1x8x128xf32>
      %17 = vector.shape_cast %16 : vector<1x8x128xf32> to vector<8x128xf32>
      %18 = arith.mulf %5, %5 : vector<16x128xf32>
      %19 = vector.shape_cast %18 : vector<16x128xf32> to vector<2x8x128xf32>
      %cst = arith.constant dense<0.000000e+00> : vector<8x128xf32>
      %20 = vector.multi_reduction <add>, %19, %cst [0] : vector<2x8x128xf32> to vector<8x128xf32>
      %21 = arith.addf %17, %20 : vector<8x128xf32>
      %c0_10 = arith.constant 0 : index
      %c0_11 = arith.constant 0 : index
      %c0_12 = arith.constant 0 : index
      %22 = vector.load %arg4[%c0_10, %c0_11, %c0_12] : memref<1x8x128xf32, #tpu.memory_space<vmem>>, vector<1x8x128xf32>
      %23 = vector.shape_cast %22 : vector<1x8x128xf32> to vector<8x128xf32>
      %24 = vector.shape_cast %21 : vector<8x128xf32> to vector<1x8x128xf32>
      tpu.vector_store %arg4[%c0_10, %c0_11, %c0_12], %24 {strides = array<i32>} : memref<1x8x128xf32, #tpu.memory_space<vmem>>, vector<1x8x128xf32>,
    } else {
    }
    %14 = arith.extui %10 : i1 to i32
    %c0_i32_6 = arith.constant 0 : i32
    %15 = arith.cmpi ne, %14, %c0_i32_6 : i32
    scf.if %15 {
      %16 = tpu.iota {dimensions = array<i32: 0>} : vector<16x128xi32>
      %c16_i32_7 = arith.constant 16 : i32
      %17 = arith.muli %7, %c16_i32_7 : i32
      %18 = vector.broadcast %17 : i32 to vector<16x128xi32>
      %19 = arith.addi %18, %16 : vector<16x128xi32>
      %c12_i32_8 = arith.constant 12 : i32
      %20 = vector.broadcast %c12_i32_8 : i32 to vector<16x128xi32>
      %21 = arith.cmpi slt, %19, %20 : vector<16x128xi32>
      %cst = arith.constant 0.000000e+00 : f32
      %22 = vector.broadcast %cst : f32 to vector<16x128xf32>
      %23 = arith.select %21, %5, %22 : vector<16x128xi1>, vector<16x128xf32>
      %c0_9 = arith.constant 0 : index
      %c0_10 = arith.constant 0 : index
      %c0_11 = arith.constant 0 : index
      %24 = vector.load %arg4[%c0_9, %c0_10, %c0_11] : memref<1x8x128xf32, #tpu.memory_space<vmem>>, vector<1x8x128xf32>
      %25 = vector.shape_cast %24 : vector<1x8x128xf32> to vector<8x128xf32>
      %26 = arith.mulf %23, %23 : vector<16x128xf32>
      %27 = vector.shape_cast %26 : vector<16x128xf32> to vector<2x8x128xf32>
      %cst_12 = arith.constant dense<0.000000e+00> : vector<8x128xf32>
      %28 = vector.multi_reduction <add>, %27, %cst_12 [0] : vector<2x8x128xf32> to vector<8x128xf32>
      %29 = arith.addf %25, %28 : vector<8x128xf32>
      %c0_13 = arith.constant 0 : index
      %c0_14 = arith.constant 0 : index
      %c0_15 = arith.constant 0 : index
      %30 = vector.load %arg4[%c0_13, %c0_14, %c0_15] : memref<1x8x128xf32, #tpu.memory_space<vmem>>, vector<1x8x128xf32>
      %31 = vector.shape_cast %30 : vector<1x8x128xf32> to vector<8x128xf32>
      %32 = vector.shape_cast %29 : vector<8x128xf32> to vector<1x8x128xf32>
      tpu.vector_store %arg4[%c0_13, %c0_14, %c0_15], %32 {strides = array<i32>} : memref<1x8x128xf32, #tpu.memory_space<vmem>>, vector<1x8x128xf32>,
    } else {
    }
    return
  }
  func.func @transform_0(%arg0: i32, %arg1: i32) -> (i32, i32) {
    %c1_i32 = arith.constant 1 : i32
    %0 = arith.muli %arg0, %c1_i32 : i32
    %1 = arith.addi %0, %arg1 : i32
    %c0_i32 = arith.constant 0 : i32
    %2 = arith.minsi %1, %c0_i32 : i32
    %c0_i32_0 = arith.constant 0 : i32
    %c0_i32_1 = arith.constant 0 : i32
    return %2, %c0_i32_0 : i32, i32
  }
  func.func @transform_1(%arg0: i32, %arg1: i32) -> (i32, i32) {
    %c1_i32 = arith.constant 1 : i32
    %0 = arith.muli %arg0, %c1_i32 : i32
    %1 = arith.addi %0, %arg1 : i32
    %c0_i32 = arith.constant 0 : i32
    %2 = arith.minsi %1, %c0_i32 : i32
    %c0_i32_0 = arith.constant 0 : i32
    %c0_i32_1 = arith.constant 0 : i32
    return %2, %c0_i32_0 : i32, i32
  }
  func.func @transform_2(%arg0: i32, %arg1: i32) -> (i32, i32, i32) {
    %c0_i32 = arith.constant 0 : i32
    %c0_i32_0 = arith.constant 0 : i32
    %c0_i32_1 = arith.constant 0 : i32
    return %arg0, %c0_i32, %c0_i32_0 : i32, i32, i32
  }
}

</mosaic_0001>

<bundles_post_ra>
// kernel: stab_loss.1
= control target key start
LH: loop header
LB: loop body
LE: loop exit
PB: predicated region body
PF: predicated region fallthrough
CT: control target
= control target key end

     0   :  { %v103_v0 = vlaneseq  ;;  %s167_s0 = inlined_call_operand.vmem [shape: f32[12,128], index: 0, kind: input, shape index: {}]   ;;  %s168_s1 = inlined_call_operand.vmem [shape: f32[12,128], index: 1, kind: input, shape index: {}]   ;;  %s169_s2 = inlined_call_operand.vmem [shape: f32[1,8,128], index: 2, kind: output, shape index: {}]  }
   0x1   :  { %v80_v1 = vld [vmem:[%s167_s0] sm:$0xff]  ;;  %v81_v2 = vld [vmem:[%s167_s0 + $0x8] sm:$0xff] }
   0x2   :  { %v82_v3 = vld [vmem:[%s168_s1] sm:$0xff]  ;;  %v83_v4 = vld [vmem:[%s168_s1 + $0x8] sm:$0xff]  ;;  %v104_v6 = vshrl.u32 %v103_v0, 7 }
   0x3   :  { %v84_v5 = vsub.f32 %v80_v1, %v82_v3  ;;  %v85_v7 = vsub.f32 %v81_v2, %v83_v4 }
   0x4   :  { %v105_v8 = vadd.s32 8, %v104_v6 }
   0x5   :  { %v115_v9 = vmul.f32 %v84_v5, %v84_v5 }
   0x6   :  { %vm111_vm0 = vcmp.lt.s32.totalorder %v105_v8, 12 }
   0x7   :  { %v113_v10 = vsel %vm111_vm0, %v85_v7, 0.0 }
   0x8   :  { %v116_v11 = vmul.f32 %v113_v10, %v113_v10 }
   0xa   :  { %v117_v12 = vadd.f32 %v116_v11, %v115_v9 }
   0xc   :  { %119 = vst [vmem:[%s169_s2] sm:$0xff] %v117_v12 }

</bundles_post_ra>
